<compile_context>
chip_gen: v7x
topology: tpu7x:2x2x1
jax: 0.10.0
libtpu: 0.0.40
codegen_flags: <defaults>
</compile_context>

<pallas_src>
import math
import functools

import jax
import jax.numpy as jnp
from jax.experimental import pallas as pl
from jax.experimental.pallas import tpu as pltpu


# ----------------------------------------------------------------------------
# Kernels
# ----------------------------------------------------------------------------

def _pe_add_kernel(x_ref, pe_ref, o_ref):
    # Eval / p==0 path: pure elementwise add at the 2x-bytes HBM roofline.
    # pe block is (ts, 1, E) and broadcasts over the batch axis.
    o_ref[...] = (x_ref[...] + pe_ref[...]).astype(o_ref.dtype)


def _pe_add_dropout_prng_kernel(x_ref, pe_ref, o_ref, *, seed, dropout_p, inv_keep):
    # Training path on TPU: in-kernel hardware PRNG -> zero extra HBM traffic.
    y = x_ref[...] + pe_ref[...]
    pltpu.prng_seed(seed + pl.program_id(0))            # unique stream per S-tile
    bits = pltpu.bitcast(pltpu.prng_random_bits(y.shape), jnp.uint32)
    thresh = jnp.uint32(min(int(dropout_p * (2.0 ** 32)), 2 ** 32 - 1))
    keep = bits >= thresh
    o_ref[...] = jnp.where(keep, y * inv_keep, jnp.zeros_like(y)).astype(o_ref.dtype)


def _pe_add_mask_kernel(x_ref, pe_ref, m_ref, o_ref, *, inv_keep):
    # Portable training fallback (non-TPU default backend): host-generated uint8
    # keep-mask streamed alongside x; inverted-dropout scaling applied in-kernel.
    y = x_ref[...] + pe_ref[...]
    keep = m_ref[...] != 0
    o_ref[...] = jnp.where(keep, y * inv_keep, jnp.zeros_like(y)).astype(o_ref.dtype)


# ----------------------------------------------------------------------------
# Parameter-setup glue (identical to the PyTorch __init__ buffer construction)
# ----------------------------------------------------------------------------

def make_pos_embedding(emb_size: int, maxlen: int = 5000, dtype=jnp.float32):
    den = jnp.exp(-jnp.arange(0, emb_size, 2, dtype=dtype)
                  * (math.log(10000.0) / emb_size))
    pos = jnp.arange(0, maxlen, dtype=dtype).reshape(maxlen, 1)
    pe = jnp.zeros((maxlen, emb_size), dtype=dtype)
    pe = pe.at[:, 0::2].set(jnp.sin(pos * den))
    pe = pe.at[:, 1::2].set(jnp.cos(pos * den))
    return pe[:, None, :]                               # (maxlen, 1, emb_size)


# ----------------------------------------------------------------------------
# Generation-aware sizing helpers
# ----------------------------------------------------------------------------

def _sublane(itemsize: int) -> int:
    # f32 -> 8, bf16 -> 16, int8/uint8 -> 32 (sub-32-bit types pack along sublanes).
    return 8 * max(1, 4 // int(itemsize))


def _round_up(n: int, m: int) -> int:
    return -(-int(n) // int(m)) * int(m)


def _vmem_budget():
    """(vmem_limit_bytes, per-buffer-set byte budget), derived from the chip generation."""
    cap = 64 * 1024 * 1024                              # conservative default = v7x per-TC VMEM
    try:
        info = pltpu.get_tpu_info()
        c = getattr(info, "vmem_capacity_bytes", None)
        if c:
            cap = int(c)
    except Exception:
        pass
    # <=48 MiB scoped on v7x (64 MiB physical); up to 96 MiB on v5e/v6e (128 MiB physical).
    limit = min(int(cap * 3 // 4), 96 * 1024 * 1024)
    # Double-buffered inputs+outputs => per buffer-set budget ~ limit/2 minus ~20% headroom.
    budget = int(limit * 2 // 5)
    return limit, budget


def _choose_tiling(S: int, row_vmem_bytes: int, budget: int):
    """Balanced S-tile: as large as the VMEM budget allows, but >=2 (even) grid steps
    when S permits so the 'parallel' grid axis can shard across v7x's two TensorCores."""
    ts_max = max(1, min(int(S), budget // max(int(row_vmem_bytes), 1)))
    n = pl.cdiv(S, ts_max)
    if S >= 2:
        n = max(n, 2)                                   # give megacore something to split
        if n % 2:
            n += 1                                      # balanced per-TC step counts
        n = min(n, S)
    ts = pl.cdiv(S, n)                                  # balanced tiles; no near-empty tail
    return int(ts), (pl.cdiv(S, ts),)


# ----------------------------------------------------------------------------
# Forward wrapper
# ----------------------------------------------------------------------------

def positional_encoding(token_embedding, pos_embedding, *, dropout_p=0.1,
                        training=True, seed=0, donate_input=False):
    S, B, E = token_embedding.shape
    assert pos_embedding.ndim == 3 and pos_embedding.shape[1] == 1
    assert pos_embedding.shape[2] == E and S <= pos_embedding.shape[0]

    dtype = token_embedding.dtype
    itemsize = jnp.dtype(dtype).itemsize
    pe_itemsize = jnp.dtype(pos_embedding.dtype).itemsize

    do_dropout = bool(training) and float(dropout_p) > 0.0
    use_prng = do_dropout and jax.default_backend() == "tpu"
    use_mask = do_dropout and not use_prng
    inv_keep = 0.0 if float(dropout_p) >= 1.0 else 1.0 / (1.0 - float(dropout_p))

    vmem_limit, budget = _vmem_budget()

    # Per-sequence-row VMEM cost of one buffer set, using the (sublane,128)-padded size
    # of the (B, E) minor dims (blocks span the full (B, E) extents, so HBM DMAs stay
    # contiguous; padding only inflates VMEM).
    bp = _round_up(B, _sublane(itemsize))
    ep = _round_up(E, 128)
    row_vmem = 2 * bp * ep * itemsize                                   # x block + out block
    row_vmem += _round_up(1, _sublane(pe_itemsize)) * ep * pe_itemsize  # pe block
    if use_mask:
        row_vmem += _round_up(B, _sublane(1)) * ep                      # uint8 keep-mask block

    ts, grid = _choose_tiling(S, row_vmem, budget)

    x_spec = pl.BlockSpec((ts, B, E), lambda i: (i, 0, 0))
    pe_spec = pl.BlockSpec((ts, 1, E), lambda i: (i, 0, 0))
    out_spec = pl.BlockSpec((ts, B, E), lambda i: (i, 0, 0))
    out_shape = jax.ShapeDtypeStruct((S, B, E), dtype)

    cparams = pltpu.CompilerParams(
        dimension_semantics=("parallel",),              # S-tiles shard across TCs (v7x)
        vmem_limit_bytes=vmem_limit,
    )
    # Reuse the embedding activation's HBM buffer when the caller donates it (under jit).
    io_alias = {0: 0} if donate_input else {}

    if not do_dropout:
        return pl.pallas_call(
            _pe_add_kernel,
            out_shape=out_shape, grid=grid,
            in_specs=[x_spec, pe_spec], out_specs=out_spec,
            compiler_params=cparams, input_output_aliases=io_alias,
        )(token_embedding, pos_embedding)

    if use_prng:
        kernel = functools.partial(
            _pe_add_dropout_prng_kernel,
            seed=int(seed), dropout_p=float(dropout_p), inv_keep=float(inv_keep))
        return pl.pallas_call(
            kernel,
            out_shape=out_shape, grid=grid,
            in_specs=[x_spec, pe_spec], out_specs=out_spec,
            compiler_params=cparams, input_output_aliases=io_alias,
        )(token_embedding, pos_embedding)

    # Portable fallback (never taken when the default backend is TPU): host-side RNG,
    # uint8 keep-mask streamed with x (1/4 the extra HBM traffic of an f32 scale array).
    key = jax.random.PRNGKey(int(seed))
    keep = jax.random.bernoulli(key, p=max(0.0, 1.0 - float(dropout_p)), shape=(S, B, E))
    mask = keep.astype(jnp.uint8)
    m_spec = pl.BlockSpec((ts, B, E), lambda i: (i, 0, 0))
    kernel = functools.partial(_pe_add_mask_kernel, inv_keep=float(inv_keep))
    return pl.pallas_call(
        kernel,
        out_shape=out_shape, grid=grid,
        in_specs=[x_spec, pe_spec, m_spec], out_specs=out_spec,
        compiler_params=cparams, input_output_aliases=io_alias,
    )(token_embedding, pos_embedding, mask)


# ----------------------------------------------------------------------------
# Demo / self-check
# ----------------------------------------------------------------------------

if __name__ == "__main__":
    DROPOUT_P = 0.1
    key = jax.random.PRNGKey(0)
    k1, k2 = jax.random.split(key)

    # Config A: awkward minor dims (B < 8, E < 128) -- exercises pe broadcast + padding path.
    SEQ, BATCH, EMB, MAXLEN = 8, 2, 32, 64
    x_a = jax.random.normal(k1, (SEQ, BATCH, EMB), dtype=jnp.float32)
    pe_a = make_pos_embedding(EMB, maxlen=MAXLEN)
    ref_a = x_a + pe_a[:SEQ]

    # Eval mode (dropout == identity): must match the plain-JAX reference.
    out_eval = positional_encoding(x_a, pe_a, dropout_p=DROPOUT_P, training=False)
    out_eval = jax.block_until_ready(out_eval)
    assert out_eval.shape == (SEQ, BATCH, EMB)
    assert jnp.allclose(out_eval, ref_a, atol=1e-6), "eval-mode mismatch (config A)"

    # Train mode: same add plus inverted dropout (deterministic seed).
    out_train = positional_encoding(x_a, pe_a, dropout_p=DROPOUT_P, training=True, seed=0)
    out_train = jax.block_until_ready(out_train)
    assert out_train.shape == (SEQ, BATCH, EMB)
    scaled_ref = ref_a / (1.0 - DROPOUT_P)
    ok = (jnp.abs(out_train) <= 1e-6) | (jnp.abs(out_train - scaled_ref) <= 1e-4)
    assert bool(jnp.all(ok)), "train-mode dropout semantics mismatch"

    # Config B: sublane/lane-dense minor dims (B=8, E=128) -- the layout realistic
    # transformer shapes hit (full vreg / unmasked store path).
    SEQ_B, BATCH_B, EMB_B = 8, 8, 128
    x_b = jax.random.normal(k2, (SEQ_B, BATCH_B, EMB_B), dtype=jnp.float32)
    pe_b = make_pos_embedding(EMB_B, maxlen=32)
    ref_b = x_b + pe_b[:SEQ_B]
    out_b = positional_encoding(x_b, pe_b, dropout_p=DROPOUT_P, training=False)
    out_b = jax.block_until_ready(out_b)
    assert jnp.allclose(out_b, ref_b, atol=1e-6), "eval-mode mismatch (config B)"

    print("KERNEL_OK")
</pallas_src>

<mosaic_0001>
module attributes {stable_mosaic.version = 11 : i64} {
  func.func @_pe_add_kernel(%arg0: i32, %arg1: memref<4x2x32xf32, #tpu.memory_space<vmem>>, %arg2: memref<4x1x32xf32, #tpu.memory_space<vmem>>, %arg3: memref<4x2x32xf32, #tpu.memory_space<vmem>>) attributes {dimension_semantics = [#tpu.dimension_semantics<parallel>], iteration_bounds = array<i64: 2>, scalar_prefetch = 0 : i64, scratch_operands = 0 : i64, tpu.core_type = #tpu.core_type<tc>, window_params = [{transform_indices = @transform_0, window_bounds = array<i64: 4, 2, 32>}, {transform_indices = @transform_1, window_bounds = array<i64: 4, 1, 32>}, {transform_indices = @transform_2, window_bounds = array<i64: 4, 2, 32>}]} {
    %c0 = arith.constant 0 : index
    %c0_0 = arith.constant 0 : index
    %c0_1 = arith.constant 0 : index
    %0 = vector.load %arg1[%c0, %c0_0, %c0_1] : memref<4x2x32xf32, #tpu.memory_space<vmem>>, vector<4x2x32xf32>
    %c0_2 = arith.constant 0 : index
    %c0_3 = arith.constant 0 : index
    %c0_4 = arith.constant 0 : index
    %1 = vector.load %arg2[%c0_2, %c0_3, %c0_4] : memref<4x1x32xf32, #tpu.memory_space<vmem>>, vector<4x1x32xf32>
    %2 = vector.broadcast %1 : vector<4x1x32xf32> to vector<4x2x32xf32>
    %3 = arith.addf %0, %2 : vector<4x2x32xf32>
    %c0_5 = arith.constant 0 : index
    %c0_6 = arith.constant 0 : index
    %c0_7 = arith.constant 0 : index
    %4 = vector.load %arg3[%c0_5, %c0_6, %c0_7] : memref<4x2x32xf32, #tpu.memory_space<vmem>>, vector<4x2x32xf32>
    tpu.vector_store %arg3[%c0_5, %c0_6, %c0_7], %3 {strides = array<i32>} : memref<4x2x32xf32, #tpu.memory_space<vmem>>, vector<4x2x32xf32>,
    return
  }
  func.func @transform_0(%arg0: i32) -> (i32, i32, i32) {
    %c0_i32 = arith.constant 0 : i32
    %c0_i32_0 = arith.constant 0 : i32
    %c0_i32_1 = arith.constant 0 : i32
    return %arg0, %c0_i32, %c0_i32_0 : i32, i32, i32
  }
  func.func @transform_1(%arg0: i32) -> (i32, i32, i32) {
    %c0_i32 = arith.constant 0 : i32
    %c0_i32_0 = arith.constant 0 : i32
    %c0_i32_1 = arith.constant 0 : i32
    return %arg0, %c0_i32, %c0_i32_0 : i32, i32, i32
  }
  func.func @transform_2(%arg0: i32) -> (i32, i32, i32) {
    %c0_i32 = arith.constant 0 : i32
    %c0_i32_0 = arith.constant 0 : i32
    %c0_i32_1 = arith.constant 0 : i32
    return %arg0, %c0_i32, %c0_i32_0 : i32, i32, i32
  }
}

</mosaic_0001>

<bundles_post_ra>
// kernel: tpu_custom_call.1
= control target key start
LH: loop header
LB: loop body
LE: loop exit
PB: predicated region body
PF: predicated region fallthrough
CT: control target
= control target key end

     0   :  { %7 = vsyncpa [#allocation3], 0  ;;  %s544_s0 = inlined_call_operand.vmem [shape: f32[8,2,32], index: 0, kind: input, shape index: {}]   ;;  %s545_s1 = inlined_call_operand.vmem [shape: f32[64,1,32], index: 1, kind: input, shape index: {}]   ;;  %s546_s2 = inlined_call_operand.hbm [shape: f32[8,2,32], index: 2, kind: output, shape index: {}]  }
   0x1   :  { %9 = vsyncpa [#allocation3 + $0x1], 0  ;;  %s431_s9 = smov 0   ;;  %s433_s10 = smov 0  }
   0x2   :  { %s435_s11 = smov 0   ;;  %s437_s12 = smov 0  }
   0x3 LB: > { %s452_s13 = sadd.s32 4294967295, %s411_s12   ;;  %s290_s14 = sadd.s32 4294967294, %s411_s12   ;;  %s411_s12 = sphi %s437_s12, %s552_s12   ;;  %s407_s11 = sphi %s435_s11, %s551_s11   ;;  %s403_s10 = sphi %s433_s10, %s550_s10   ;;  %s399_s9 = sphi %s431_s9, %s549_s9  }
   0x4   : > { %s456_s15 = sadd.s32 1, %s411_s12   ;;  %s74_s16 = sadd.s32 1, %s407_s11 }
   0x5   : > { %s71_s17 = ssub.s32 %s411_s12, %s456_s15  ;;  %p84_p0 = scmp.ne.s32.totalorder %s407_s11, %s403_s10 }
   0x6   : > { %p72_p1 = scmp.eq.s32.totalorder %s71_s17, 0  ;;  %p85_p2 = scmp.eq.s32.totalorder %s452_s13, 1 }
   0x7   : > { %p90_p3 = scmp.ne.s32.totalorder %s403_s10, %s399_s9  ;;  %p91_p4 = scmp.eq.s32.totalorder %s290_s14, 1 }
   0x8   : > { %s467_s18 = scalar_select %p72_p1, %s407_s11, %s74_s16  }
   0x9   : > { %p469_p5 = por %p85_p2, %p84_p0  ;;  %p473_p6 = por %p91_p4, %p90_p3 }
   0xa   : > { %p293_p7 = scmp.ge.s32.totalorder %s411_s12, 1  ;;  %p126_p8 = scmp.lt.s32.totalorder %s411_s12, 3 }
   0xc   : > { %p127_p9 = pnand %p293_p7, %p126_p8 }
   0xd   : > { %s149_s21 = sand.u32 (!%p127_p9), 1, %s403_s10   ;;  %s295_s22 = sshll.u32 (!%p127_p9), %s452_s13, 2  ;;  %vm200_vm0 = vcmask (!%p127_p9), 254976  }
   0xe   : > { %130 = sbr.rel (%p127_p9) target bundleno = 48 (0x30), region = 28  ;;  %s294_s23 = sshll.u32 (!%p127_p9), %s149_s21, 3 }
   0xf   : > { %p153_p10 = scmp.lt.s32.totalorder (!%p127_p9), %s295_s22, 7  ;;  %p159_p11 = scmp.lt.s32.totalorder (!%p127_p9), %s295_s22, 63 }
  0x10   : > { %s151_s4 = scalar_lea.vmem (!%p127_p9), [#allocation2], %s294_s23  ;;  %s307_s6 = sshll.u32 (!%p127_p9), %s452_s13, 7 }
  0x11   : > { %s219_s5 = sshll.u32 (!%p127_p9), %s151_s4, 4  ;;  %s495_s14 = scalar_lea.hbm (!%p127_p9), %s546_s2, %s307_s6  ;;  %s490_s5 = int_to_ptr.vmem [resolvable:$true] %s219_s5 }
  0x12   : > { %s503_s13 = scalar_lea.sflag (!%p127_p9), [#allocation3], %s149_s21  ;;  %s349_s16 = scalar_lea.vmem (!%p127_p9), %s490_s5, 128 }
  0x13   : > { %p350_p12 = scmp.ne.s32.totalorder (!%p127_p9), %s490_s5, %s349_s16  ;;  %s413_s17 = smov (!%p127_p9), [#allocation2]  }
  0x15   : > { %s154_s24 = scalar_select %p153_p10, %s295_s22, 7 }
  0x16   : > { %s554_s22 = smov (!%p159_p11, %s295_s22), 63  ;;  %p351_p13 = pnand %p350_p12, %p469_p5 }
  0x17   : > { %s296_s25 = sshll.u32 %s154_s24, 1  ;;  %s161_s3 = scalar_lea.vmem %s545_s1, %s554_s22 }
  0x18   : > { %s156_s28 = scalar_lea.vmem %s544_s0, %s296_s25  ;;  %v298_v1 = vld [vmem:[%s161_s3] ss:$0 sm:$0xff]  ;;  %v299_v4 = vld [vmem:[%s161_s3 + $0x1] ss:$0 sm:$0xff]  ;;  %v300_v7 = vld [vmem:[%s161_s3 + $0x2] ss:$0 sm:$0xff]  ;;  %p352_p0 = pneg %p351_p13 }
  0x19   : > { %v164_v0 = vld [vmem:[%s156_s28] sm:$0x3]  ;;  %v165_v3 = vld [vmem:[%s156_s28 + $0x2] sm:$0x3]  ;;  %v166_v5 = vld [vmem:[%s156_s28 + $0x4] sm:$0x3] }
  0x1a   : > { %v196_v2 = vadd.f32 %v298_v1, %v164_v0  ;;  %v197_v6 = vadd.f32 %v299_v4, %v165_v3  ;;  %v167_v8 = vld [vmem:[%s156_s28 + $0x6] sm:$0x3]  ;;  %v301_v9 = vld [vmem:[%s161_s3 + $0x3] ss:$0 sm:$0xff]  ;;  %v198_v10 = vadd.f32 %v300_v7, %v166_v5  ;;  %s353_s22 = sshll.u32 %s413_s17, 4  ;;  %s354_s22 = int_to_ptr.vmem [resolvable:$false] %s353_s22 }
  0x1b   : > { %v199_v11 = vadd.f32 %v301_v9, %v167_v8  ;;  %s355_s23 = scalar_lea.vmem %s354_s22, 256  ;;  %p356_p1 = scmp.lt.s32.totalorder %s490_s5, %s354_s22 }
  0x1c   : > { %201 = vst.msk [vmem:[%s151_s4] sm:$0x3] %vm200_vm0, %v196_v2  ;;  %202 = vst.msk [vmem:[%s151_s4 + $0x2] sm:$0x3] %vm200_vm0, %v197_v6  ;;  %p357_p2 = scmp.lt.s32.totalorder %s355_s23, %s349_s16 }
  0x1d   : > { %203 = vst.msk [vmem:[%s151_s4 + $0x4] sm:$0x3] %vm200_vm0, %v198_v10  ;;  %204 = vst.msk [vmem:[%s151_s4 + $0x6] sm:$0x3] %vm200_vm0, %v199_v11 }
  0x1e   : > { %p358_p3 = por %p357_p2, %p356_p1 }
  0x20   : > { %p359_p4 = pnand %p358_p3, %p352_p0 }
  0x22   : > { %362 = shalt.err (!%p359_p4)
}
  0x23   : > { %s363_s21 = scalar_lea.hbm %s495_s14, 128  ;;  %s367_s26 = scalar_lea.hbm %s546_s2, 256 }
  0x24   : > { %p364_p7 = scmp.ne.s32.totalorder %s495_s14, %s363_s21  ;;  %p368_p10 = scmp.lt.u32.totalorder %s495_s14, %s546_s2 }
  0x25   : > { %p369_p11 = scmp.lt.u32.totalorder %s367_s26, %s363_s21  ;;  %p371_p13 = scmp.lt.u32.totalorder %s363_s21, %s495_s14 }
  0x26   : > { %p365_p8 = pnand %p364_p7, %p469_p5 }
  0x27   : > { %p370_p12 = por %p369_p11, %p368_p10 }
  0x28   : > { %p366_p9 = pneg %p365_p8 }
  0x29   : > { %p372_p0 = por %p371_p13, %p370_p12 }
  0x2b   : > { %p373_p1 = pnand %p372_p0, %p366_p9 }
  0x2d   : > { %376 = shalt.err (!%p373_p1)
}
  0x2e   : > { %s414_s29 = smov 32   ;;  %s415_s30 = smov 2  }
  0x2f   : > { %308 = dma.vmem_to_hbm [thread:$0]  (%p469_p5), %s490_s5, 128, %s495_s14, %s503_s13, %s414_s29, %s414_s29, %s415_s30  }
  0x30 PF: > { %p314_p2 = scmp.ge.s32.totalorder %s411_s12, 2  ;;  %s234_s3 = sand.u32 1, %s399_s9  }
  0x31   : > { %s235_s4 = scalar_lea.sflag [#allocation3], %s234_s3 }
  0x32   : > { %p311_p3 = pnand %p314_p2, %p473_p6 }
  0x34   : > { %394 = dma.done.wait (!%p311_p3), %s235_s4, 128  }
  0x35   : > { %396 = vsyncadd (!%p311_p3), %s235_s4, 4294967168  ;;  %p12_p4 = scmp.ge.s32.totalorder %s456_s15, 4   ;;  %s549_s9 = smov %s403_s10 }
  0x36   : > { %s550_s10 = smov %s407_s11  ;;  %s551_s11 = smov %s467_s18 }
  0x37   : > { %s552_s12 = smov %s456_s15  ;;  %14 = sbr.rel (!%p12_p4) target bundleno = 3 (0x3), region = 66 }
  0x3e   :  { %240 = vsyncpa [#allocation3], 1 }
  0x3f   :  { %242 = vsyncpa [#allocation3 + $0x1], 1 }

</bundles_post_ra>
